<compile_context>
chip_gen: v5e
topology: v5e:2x2
jax: 0.10.0
libtpu: 0.0.40
codegen_flags: <defaults>
</compile_context>

<pallas_src>
import functools

import jax
import jax.numpy as jnp
from jax.experimental import pallas as pl
from jax.experimental.pallas import tpu as pltpu

IN_FEATURES = 30 * 30 * 3     # 2700 (full-K block, no host padding)
HIDDEN = 128
OUT = 5
OUT_PAD = 128                 # lane-dense output tile (zero-padded cols, sliced in wrapper)
TM_MAX = 1024                 # max batch rows per grid step (f32 tile ~11 MiB, 2x buffered)


def mlp_kernel(x_ref, w1_ref, b1_ref, w2_ref, b2_ref, o_ref):
    # fc1: cast the f32 activation tile to bf16 just before the MXU; f32 accumulation.
    x_b = x_ref[...].astype(jnp.bfloat16)                       # (TM, 2700)
    h = jnp.dot(x_b, w1_ref[...], preferred_element_type=jnp.float32)
    # bias + ReLU in f32 (VPU has huge slack; kernel is HBM-bound anyway).
    h = jnp.maximum(h + b1_ref[...], 0.0)
    # fc2: back to bf16 for the MXU, f32 accumulation, f32 bias add.
    y = jnp.dot(h.astype(jnp.bfloat16), w2_ref[...],
                preferred_element_type=jnp.float32)
    o_ref[...] = (y + b2_ref[...]).astype(o_ref.dtype)


def _round_up(n, m):
    return ((n + m - 1) // m) * m


def _pick_tm(b):
    """Batch tile: >=16 rows, >=2 grid steps when possible (v7x megacore), <=1024 rows."""
    b16 = _round_up(max(int(b), 1), 16)
    tm = _round_up(max(b16 // 2, 16), 16)
    return min(TM_MAX, tm)


@functools.partial(jax.jit, static_argnames=("tm",))
def _nn_forward_impl(x_nchw, w1, b1, w2, b2, *, tm):
    b = x_nchw.shape[0]
    # torch .view(B, -1) on contiguous NCHW == reshape; no copy, stays f32.
    x_flat = x_nchw.reshape(b, IN_FEATURES)
    b_pad = _round_up(b, tm)
    if b_pad != b:
        # Only pads the (small) batch remainder; no K pad, no dtype cast pass.
        x_flat = jnp.pad(x_flat, ((0, b_pad - b), (0, 0)))

    # Weight prep is tiny (<1 MiB total) and one-shot inside the jit.
    w1b = w1.astype(jnp.bfloat16)                                    # (2700, 128)
    w2p = jnp.pad(w2, ((0, 0), (0, OUT_PAD - OUT))).astype(jnp.bfloat16)  # (128, 128)
    b2p = jnp.pad(b2, ((0, 0), (0, OUT_PAD - OUT)))                  # (1, 128) f32

    out = pl.pallas_call(
        mlp_kernel,
        out_shape=jax.ShapeDtypeStruct((b_pad, OUT_PAD), jnp.float32),
        grid=(b_pad // tm,),
        in_specs=[
            pl.BlockSpec((tm, IN_FEATURES), lambda i: (i, 0)),       # x tile streams (f32)
            pl.BlockSpec((IN_FEATURES, HIDDEN), lambda i: (0, 0)),   # w1 resident (bf16)
            pl.BlockSpec((1, HIDDEN), lambda i: (0, 0)),             # b1 resident (f32)
            pl.BlockSpec((HIDDEN, OUT_PAD), lambda i: (0, 0)),       # w2 resident (bf16)
            pl.BlockSpec((1, OUT_PAD), lambda i: (0, 0)),            # b2 resident (f32)
        ],
        out_specs=pl.BlockSpec((tm, OUT_PAD), lambda i: (i, 0)),
        compiler_params=pltpu.CompilerParams(
            dimension_semantics=("parallel",),
            vmem_limit_bytes=32 << 20,
        ),
    )(x_flat, w1b, b1, w2p, b2p)
    # Strip batch + output-column padding.
    return out[:b, :OUT]


def nn_forward(x_nchw, w1, b1, w2, b2):
    tm = _pick_tm(x_nchw.shape[0])
    return _nn_forward_impl(x_nchw, w1, b1, w2, b2, tm=tm)


def init_params(key):
    # Mirrors nn.Linear default init: U(-1/sqrt(fan_in), 1/sqrt(fan_in)).
    k1, k2, k3, k4 = jax.random.split(key, 4)
    bound1 = 1.0 / jnp.sqrt(jnp.float32(IN_FEATURES))
    bound2 = 1.0 / jnp.sqrt(jnp.float32(HIDDEN))
    w1 = jax.random.uniform(k1, (IN_FEATURES, HIDDEN), jnp.float32, -bound1, bound1)
    b1 = jax.random.uniform(k2, (1, HIDDEN), jnp.float32, -bound1, bound1)
    w2 = jax.random.uniform(k3, (HIDDEN, OUT), jnp.float32, -bound2, bound2)
    b2 = jax.random.uniform(k4, (1, OUT), jnp.float32, -bound2, bound2)
    return w1, b1, w2, b2


if __name__ == "__main__":
    key = jax.random.PRNGKey(0)
    kx, kp = jax.random.split(key)
    batch = 2
    x = jax.random.normal(kx, (batch, 3, 30, 30), jnp.float32)  # NCHW like PyTorch
    w1, b1, w2, b2 = init_params(kp)

    out = nn_forward(x, w1, b1, w2, b2)
    jax.block_until_ready(out)

    # f32 reference; kernel uses bf16 weights/activations on the MXU, so allow
    # bf16-level tolerance.
    ref = jnp.maximum(x.reshape(batch, -1) @ w1 + b1, 0.0) @ w2 + b2
    assert out.shape == (batch, OUT)
    assert jnp.allclose(out, ref, atol=5e-2, rtol=5e-2)
    print("KERNEL_OK")
</pallas_src>

<mosaic_0001>
module attributes {stable_mosaic.version = 11 : i64} {
  func.func @mlp_kernel(%arg0: i32, %arg1: memref<16x2700xf32, #tpu.memory_space<vmem>>, %arg2: memref<2700x128xbf16, #tpu.memory_space<vmem>>, %arg3: memref<1x128xf32, #tpu.memory_space<vmem>>, %arg4: memref<128x128xbf16, #tpu.memory_space<vmem>>, %arg5: memref<1x128xf32, #tpu.memory_space<vmem>>, %arg6: memref<16x128xf32, #tpu.memory_space<vmem>>) attributes {dimension_semantics = [#tpu.dimension_semantics<parallel>], iteration_bounds = array<i64: 1>, scalar_prefetch = 0 : i64, scratch_operands = 0 : i64, tpu.core_type = #tpu.core_type<tc>, window_params = [{transform_indices = @transform_0, window_bounds = array<i64: 16, 2700>}, {pipeline_mode = #tpu.pipeline_mode<synchronous>, transform_indices = @transform_1, window_bounds = array<i64: 2700, 128>}, {pipeline_mode = #tpu.pipeline_mode<synchronous>, transform_indices = @transform_2, window_bounds = array<i64: 1, 128>}, {pipeline_mode = #tpu.pipeline_mode<synchronous>, transform_indices = @transform_3, window_bounds = array<i64: 128, 128>}, {pipeline_mode = #tpu.pipeline_mode<synchronous>, transform_indices = @transform_4, window_bounds = array<i64: 1, 128>}, {transform_indices = @transform_5, window_bounds = array<i64: 16, 128>}]} {
    %c0 = arith.constant 0 : index
    %c0_0 = arith.constant 0 : index
    %0 = vector.load %arg1[%c0, %c0_0] : memref<16x2700xf32, #tpu.memory_space<vmem>>, vector<16x2700xf32>
    %1 = arith.truncf %0 : vector<16x2700xf32> to vector<16x2700xbf16>
    %c0_1 = arith.constant 0 : index
    %c0_2 = arith.constant 0 : index
    %2 = vector.load %arg2[%c0_1, %c0_2] : memref<2700x128xbf16, #tpu.memory_space<vmem>>, vector<2700x128xbf16>
    %cst = arith.constant dense<0.000000e+00> : vector<16x128xf32>
    %3 = tpu.matmul %1, %2, %cst {dimension_numbers = #tpu.dot_dimension_numbers<[1], [0], [0], [1], [0, 0, 1, 1], [], []>} : vector<16x2700xbf16>, vector<2700x128xbf16>, vector<16x128xf32> -> vector<16x128xf32>
    %c0_3 = arith.constant 0 : index
    %c0_4 = arith.constant 0 : index
    %4 = vector.load %arg3[%c0_3, %c0_4] : memref<1x128xf32, #tpu.memory_space<vmem>>, vector<1x128xf32>
    %5 = vector.broadcast %4 : vector<1x128xf32> to vector<16x128xf32>
    %6 = arith.addf %3, %5 : vector<16x128xf32>
    %cst_5 = arith.constant 0.000000e+00 : f32
    %7 = vector.broadcast %cst_5 : f32 to vector<16x128xf32>
    %8 = arith.maximumf %6, %7 : vector<16x128xf32>
    %9 = arith.truncf %8 : vector<16x128xf32> to vector<16x128xbf16>
    %c0_6 = arith.constant 0 : index
    %c0_7 = arith.constant 0 : index
    %10 = vector.load %arg4[%c0_6, %c0_7] : memref<128x128xbf16, #tpu.memory_space<vmem>>, vector<128x128xbf16>
    %cst_8 = arith.constant dense<0.000000e+00> : vector<16x128xf32>
    %11 = tpu.matmul %9, %10, %cst_8 {dimension_numbers = #tpu.dot_dimension_numbers<[1], [0], [0], [1], [0, 0, 1, 1], [], []>} : vector<16x128xbf16>, vector<128x128xbf16>, vector<16x128xf32> -> vector<16x128xf32>
    %c0_9 = arith.constant 0 : index
    %c0_10 = arith.constant 0 : index
    %12 = vector.load %arg5[%c0_9, %c0_10] : memref<1x128xf32, #tpu.memory_space<vmem>>, vector<1x128xf32>
    %13 = vector.broadcast %12 : vector<1x128xf32> to vector<16x128xf32>
    %14 = arith.addf %11, %13 : vector<16x128xf32>
    %c0_11 = arith.constant 0 : index
    %c0_12 = arith.constant 0 : index
    %15 = vector.load %arg6[%c0_11, %c0_12] : memref<16x128xf32, #tpu.memory_space<vmem>>, vector<16x128xf32>
    tpu.vector_store %arg6[%c0_11, %c0_12], %14 {strides = array<i32>} : memref<16x128xf32, #tpu.memory_space<vmem>>, vector<16x128xf32>,
    return
  }
  func.func @transform_0(%arg0: i32) -> (i32, i32) {
    %c0_i32 = arith.constant 0 : i32
    %c0_i32_0 = arith.constant 0 : i32
    return %arg0, %c0_i32 : i32, i32
  }
  func.func @transform_1(%arg0: i32) -> (i32, i32) {
    %c0_i32 = arith.constant 0 : i32
    %c0_i32_0 = arith.constant 0 : i32
    %c0_i32_1 = arith.constant 0 : i32
    return %c0_i32, %c0_i32_0 : i32, i32
  }
  func.func @transform_2(%arg0: i32) -> (i32, i32) {
    %c0_i32 = arith.constant 0 : i32
    %c0_i32_0 = arith.constant 0 : i32
    %c0_i32_1 = arith.constant 0 : i32
    return %c0_i32, %c0_i32_0 : i32, i32
  }
  func.func @transform_3(%arg0: i32) -> (i32, i32) {
    %c0_i32 = arith.constant 0 : i32
    %c0_i32_0 = arith.constant 0 : i32
    %c0_i32_1 = arith.constant 0 : i32
    return %c0_i32, %c0_i32_0 : i32, i32
  }
  func.func @transform_4(%arg0: i32) -> (i32, i32) {
    %c0_i32 = arith.constant 0 : i32
    %c0_i32_0 = arith.constant 0 : i32
    %c0_i32_1 = arith.constant 0 : i32
    return %c0_i32, %c0_i32_0 : i32, i32
  }
  func.func @transform_5(%arg0: i32) -> (i32, i32) {
    %c0_i32 = arith.constant 0 : i32
    %c0_i32_0 = arith.constant 0 : i32
    return %arg0, %c0_i32 : i32, i32
  }
}

</mosaic_0001>

<bundles_post_ra>
// kernel: _nn_forward_impl.1
= control target key start
LH: loop header
LB: loop body
LE: loop exit
PB: predicated region body
PF: predicated region fallthrough
CT: control target
= control target key end

     0   :  { %vm1446_vm0 = vcmask 1045504   ;;  %vm1442_vm1 = vcmask 97280   ;;  %s3445_s1 = inlined_call_operand.vmem [shape: bf16[2700,128], index: 1, kind: input, shape index: {}]   ;;  %s3446_s0 = inlined_call_operand.vmem [shape: f32[16,2700], index: 0, kind: input, shape index: {}]   ;;  %s3447_s2 = inlined_call_operand.vmem [shape: f32[1,128], index: 2, kind: input, shape index: {}]   ;;  %s3448_s4 = inlined_call_operand.vmem [shape: f32[1,128], index: 4, kind: input, shape index: {}]   ;;  %s3449_s3 = inlined_call_operand.vmem [shape: bf16[128,128], index: 3, kind: input, shape index: {}]   ;;  %s3450_s5 = inlined_call_operand.vmem [shape: f32[16,128], index: 5, kind: output, shape index: {}]  }
   0x1   :  { %v2565_v0 = vld [vmem:[%s3445_s1 + $0x38] sm:$0xff]  ;;  %v2564_v4 = vld [vmem:[%s3445_s1 + $0x30] sm:$0xff]  ;;  %v2563_v8 = vld [vmem:[%s3445_s1 + $0x28] sm:$0xff] }
   0x2   :  { %v2581_v1 = vld [vmem:[%s3445_s1 + $0xb8] sm:$0xff]  ;;  %1450 = vmatpush.bf16.msra.mxu0 %v2565_v0  ;;  %v2580_v5 = vld [vmem:[%s3445_s1 + $0xb0] sm:$0xff]  ;;  %v2579_v9 = vld [vmem:[%s3445_s1 + $0xa8] sm:$0xff] }
   0x3   :  { %v2573_v2 = vld [vmem:[%s3445_s1 + $0x78] sm:$0xff]  ;;  %1478 = vmatpush.bf16.msra.mxu2 %v2581_v1  ;;  %v2572_v6 = vld [vmem:[%s3445_s1 + $0x70] sm:$0xff]  ;;  %v2571_v10 = vld [vmem:[%s3445_s1 + $0x68] sm:$0xff] }
   0x4   :  { %v2589_v3 = vld [vmem:[%s3445_s1 + $0xf8] sm:$0xff]  ;;  %1464 = vmatpush.bf16.msra.mxu1 %v2573_v2  ;;  %v2588_v7 = vld [vmem:[%s3445_s1 + $0xf0] sm:$0xff]  ;;  %v2587_v11 = vld [vmem:[%s3445_s1 + $0xe8] sm:$0xff] }
   0x5   :  { %1492 = vmatpush.bf16.msra.mxu3 %v2589_v3  ;;  %v2562_v12 = vld [vmem:[%s3445_s1 + $0x20] sm:$0xff]  ;;  %v2561_v16 = vld [vmem:[%s3445_s1 + $0x18] sm:$0xff]  ;;  %v2560_v20 = vld [vmem:[%s3445_s1 + $0x10] sm:$0xff] }
   0x6   :  { %1451 = vmatpush.bf16.msra.mxu0 %v2564_v4  ;;  %v2578_v13 = vld [vmem:[%s3445_s1 + $0xa0] sm:$0xff]  ;;  %v2577_v17 = vld [vmem:[%s3445_s1 + $0x98] sm:$0xff]  ;;  %v2576_v21 = vld [vmem:[%s3445_s1 + $0x90] sm:$0xff] }
   0x7   :  { %1479 = vmatpush.bf16.msra.mxu2 %v2580_v5  ;;  %v2570_v14 = vld [vmem:[%s3445_s1 + $0x60] sm:$0xff]  ;;  %v2569_v18 = vld [vmem:[%s3445_s1 + $0x58] sm:$0xff]  ;;  %v2568_v22 = vld [vmem:[%s3445_s1 + $0x50] sm:$0xff] }
   0x8   :  { %1465 = vmatpush.bf16.msra.mxu1 %v2572_v6  ;;  %v2586_v15 = vld [vmem:[%s3445_s1 + $0xe0] sm:$0xff]  ;;  %v2585_v19 = vld [vmem:[%s3445_s1 + $0xd8] sm:$0xff]  ;;  %v2584_v23 = vld [vmem:[%s3445_s1 + $0xd0] sm:$0xff] }
   0x9   :  { %1493 = vmatpush.bf16.msra.mxu3 %v2588_v7  ;;  %v2559_v24 = vld [vmem:[%s3445_s1 + $0x8] sm:$0xff]  ;;  %v2558_v28 = vld [vmem:[%s3445_s1] sm:$0xff]  ;;  %v2597_v30 = vld [vmem:[%s3445_s1 + $0x138] sm:$0xff] }
   0xa   :  { %1452 = vmatpush.bf16.msra.mxu0 %v2563_v8  ;;  %v2575_v25 = vld [vmem:[%s3445_s1 + $0x88] sm:$0xff]  ;;  %v2574_v29 = vld [vmem:[%s3445_s1 + $0x80] sm:$0xff]  ;;  %v2613_v31 = vld [vmem:[%s3445_s1 + $0x1b8] sm:$0xff] }
   0xb   :  { %1480 = vmatpush.bf16.msra.mxu2 %v2579_v9  ;;  %v2567_v26 = vld [vmem:[%s3445_s1 + $0x48] sm:$0xff]  ;;  %v2566_v32 = vld [vmem:[%s3445_s1 + $0x40] sm:$0xff]  ;;  %v43_v35 = vld [vmem:[%s3446_s0 + $0xb0] sm:$0xff] }
   0xc   :  { %1466 = vmatpush.bf16.msra.mxu1 %v2571_v10  ;;  %v2583_v27 = vld [vmem:[%s3445_s1 + $0xc8] sm:$0xff]  ;;  %v2582_v33 = vld [vmem:[%s3445_s1 + $0xc0] sm:$0xff]  ;;  %v23_v36 = vld [vmem:[%s3446_s0 + $0x10] sm:$0xff] }
   0xd   :  { %1494 = vmatpush.bf16.msra.mxu3 %v2587_v11  ;;  %v21_v34 = vld [vmem:[%s3446_s0] sm:$0xff]  ;;  %v2605_v38 = vld [vmem:[%s3445_s1 + $0x178] sm:$0xff]  ;;  %v22_v40 = vld [vmem:[%s3446_s0 + $0x8] sm:$0xff] }
   0xe   :  { %1453 = vmatpush.bf16.msra.mxu0 %v2562_v12  ;;  %v45_v37 = vld [vmem:[%s3446_s0 + $0xc0] sm:$0xff]  ;;  %v2621_v39 = vld [vmem:[%s3445_s1 + $0x1f8] sm:$0xff]  ;;  %v46_v43 = vld [vmem:[%s3446_s0 + $0xc8] sm:$0xff]  ;;  %v65_v44 = vpack.c.bf16 %v43_v35, %v21_v34 }
   0xf   :  { %1481 = vmatpush.bf16.msra.mxu2 %v2578_v13  ;;  %v44_v41 = vld [vmem:[%s3446_s0 + $0xb8] sm:$0xff]  ;;  %v67_v45 = vpack.c.bf16 %v45_v37, %v23_v36  ;;  %v2596_v46 = vld [vmem:[%s3445_s1 + $0x130] sm:$0xff]  ;;  %v2595_v52 = vld [vmem:[%s3445_s1 + $0x128] sm:$0xff] }
  0x10   :  { %1467 = vmatpush.bf16.msra.mxu1 %v2570_v14  ;;  %v24_v42 = vld [vmem:[%s3446_s0 + $0x18] sm:$0xff]  ;;  %v2612_v47 = vld [vmem:[%s3445_s1 + $0x1b0] sm:$0xff]  ;;  %v66_v48 = vpack.c.bf16 %v44_v41, %v22_v40  ;;  %v2611_v53 = vld [vmem:[%s3445_s1 + $0x1a8] sm:$0xff] }
  0x11   :  { %1495 = vmatpush.bf16.msra.mxu3 %v2586_v15  ;;  %v68_v49 = vpack.c.bf16 %v46_v43, %v24_v42  ;;  %v2604_v50 = vld [vmem:[%s3445_s1 + $0x170] sm:$0xff]  ;;  %v2603_v54 = vld [vmem:[%s3445_s1 + $0x168] sm:$0xff]  ;;  %v2594_v56 = vld [vmem:[%s3445_s1 + $0x120] sm:$0xff] }
  0x12   :  { %1454 = vmatpush.bf16.msra.mxu0 %v2561_v16  ;;  %v2620_v51 = vld [vmem:[%s3445_s1 + $0x1f0] sm:$0xff]  ;;  %v2619_v55 = vld [vmem:[%s3445_s1 + $0x1e8] sm:$0xff]  ;;  %v2610_v57 = vld [vmem:[%s3445_s1 + $0x1a0] sm:$0xff] }
  0x13   :  { %1482 = vmatpush.bf16.msra.mxu2 %v2577_v17  ;;  %v2602_v58 = vld [vmem:[%s3445_s1 + $0x160] sm:$0xff]  ;;  %v2593_v60 = vld [vmem:[%s3445_s1 + $0x118] sm:$0xff]  ;;  %v2592_v0 = vld [vmem:[%s3445_s1 + $0x110] sm:$0xff] }
  0x14   :  { %1468 = vmatpush.bf16.msra.mxu1 %v2569_v18  ;;  %v2618_v59 = vld [vmem:[%s3445_s1 + $0x1e0] sm:$0xff]  ;;  %v2609_v61 = vld [vmem:[%s3445_s1 + $0x198] sm:$0xff]  ;;  %v2608_v1 = vld [vmem:[%s3445_s1 + $0x190] sm:$0xff] }
  0x15   :  { %1496 = vmatpush.bf16.msra.mxu3 %v2585_v19  ;;  %v2601_v62 = vld [vmem:[%s3445_s1 + $0x158] sm:$0xff]  ;;  %v2600_v2 = vld [vmem:[%s3445_s1 + $0x150] sm:$0xff]  ;;  %v2591_v4 = vld [vmem:[%s3445_s1 + $0x108] sm:$0xff] }
  0x16   :  { %1455 = vmatpush.bf16.msra.mxu0 %v2560_v20  ;;  %v2617_v63 = vld [vmem:[%s3445_s1 + $0x1d8] sm:$0xff]  ;;  %v2616_v3 = vld [vmem:[%s3445_s1 + $0x1d0] sm:$0xff]  ;;  %v2607_v5 = vld [vmem:[%s3445_s1 + $0x188] sm:$0xff] }
  0x17   :  { %1483 = vmatpush.bf16.msra.mxu2 %v2576_v21  ;;  %v2599_v6 = vld [vmem:[%s3445_s1 + $0x148] sm:$0xff]  ;;  %v2590_v8 = vld [vmem:[%s3445_s1 + $0x100] sm:$0xff]  ;;  %v2629_v10 = vld [vmem:[%s3445_s1 + $0x238] sm:$0xff] }
  0x18   :  { %1469 = vmatpush.bf16.msra.mxu1 %v2568_v22  ;;  %v2615_v7 = vld [vmem:[%s3445_s1 + $0x1c8] sm:$0xff]  ;;  %v2606_v9 = vld [vmem:[%s3445_s1 + $0x180] sm:$0xff]  ;;  %v2645_v11 = vld [vmem:[%s3445_s1 + $0x2b8] sm:$0xff] }
  0x19   :  { %1497 = vmatpush.bf16.msra.mxu3 %v2584_v23  ;;  %v25_v12 = vld [vmem:[%s3446_s0 + $0x20] sm:$0xff]  ;;  %v47_v13 = vld [vmem:[%s3446_s0 + $0xd0] sm:$0xff]  ;;  %v26_v18 = vld [vmem:[%s3446_s0 + $0x28] sm:$0xff] }
  0x1a   :  { %1456 = vmatpush.bf16.msra.mxu0 %v2559_v24  ;;  %v27_v14 = vld [vmem:[%s3446_s0 + $0x30] sm:$0xff]  ;;  %v49_v15 = vld [vmem:[%s3446_s0 + $0xe0] sm:$0xff]  ;;  %v48_v19 = vld [vmem:[%s3446_s0 + $0xd8] sm:$0xff]  ;;  %v69_v22 = vpack.c.bf16 %v47_v13, %v25_v12 }
  0x1b   :  { %1484 = vmatpush.bf16.msra.mxu2 %v2575_v25  ;;  %v2598_v16 = vld [vmem:[%s3445_s1 + $0x140] sm:$0xff]  ;;  %v28_v20 = vld [vmem:[%s3446_s0 + $0x38] sm:$0xff]  ;;  %v50_v21 = vld [vmem:[%s3446_s0 + $0xe8] sm:$0xff]  ;;  %v71_v23 = vpack.c.bf16 %v49_v15, %v27_v14 }
  0x1c   :  { %1470 = vmatpush.bf16.msra.mxu1 %v2567_v26  ;;  %v2614_v17 = vld [vmem:[%s3445_s1 + $0x1c0] sm:$0xff]  ;;  %v2637_v24 = vld [vmem:[%s3445_s1 + $0x278] sm:$0xff]  ;;  %v70_v26 = vpack.c.bf16 %v48_v19, %v26_v18  ;;  %v2635_v34 = vld [vmem:[%s3445_s1 + $0x268] sm:$0xff] }
  0x1d   :  { %1498 = vmatpush.bf16.msra.mxu3 %v2583_v27  ;;  %v2653_v25 = vld [vmem:[%s3445_s1 + $0x2f8] sm:$0xff]  ;;  %v72_v27 = vpack.c.bf16 %v50_v21, %v28_v20  ;;  %v2651_v35 = vld [vmem:[%s3445_s1 + $0x2e8] sm:$0xff]  ;;  %v2626_v36 = vld [vmem:[%s3445_s1 + $0x220] sm:$0xff] }
  0x1e   :  { %1457 = vmatpush.bf16.msra.mxu0 %v2558_v28  ;;  %v2628_v28 = vld [vmem:[%s3445_s1 + $0x230] sm:$0xff]  ;;  %v2642_v37 = vld [vmem:[%s3445_s1 + $0x2a0] sm:$0xff]  ;;  %v2625_v40 = vld [vmem:[%s3445_s1 + $0x218] sm:$0xff] }
  0x1f   :  { %1485 = vmatpush.bf16.msra.mxu2 %v2574_v29  ;;  %v2644_v29 = vld [vmem:[%s3445_s1 + $0x2b0] sm:$0xff]  ;;  %v2641_v41 = vld [vmem:[%s3445_s1 + $0x298] sm:$0xff]  ;;  %v2659_v12 = vld [vmem:[%s3445_s1 + $0x328] sm:$0xff] }
  0x20   :  { %1471 = vmatpush.bf16.msra.mxu1 %v2566_v32  ;;  %v2627_v32 = vld [vmem:[%s3445_s1 + $0x228] sm:$0xff]  ;;  %v2633_v42 = vld [vmem:[%s3445_s1 + $0x258] sm:$0xff]  ;;  %v2666_v18 = vld [vmem:[%s3445_s1 + $0x360] sm:$0xff] }
  0x21   :  { %1499 = vmatpush.bf16.msra.mxu3 %v2582_v33  ;;  %1458 = vmatmul.bf16.vlgmr.msra.gmra.mxu0 %v65_v44  ;;  %v2643_v33 = vld [vmem:[%s3445_s1 + $0x2a8] sm:$0xff]  ;;  %v2649_v43 = vld [vmem:[%s3445_s1 + $0x2d8] sm:$0xff]  ;;  %v2624_v44 = vld [vmem:[%s3445_s1 + $0x210] sm:$0xff] }
  0x22   :  { %1506 = vmatpush.bf16.msrb.mxu0 %v2597_v30  ;;  %1486 = vmatmul.bf16.vlgmr.msra.gmra.mxu2 %v67_v45  ;;  %v2636_v30 = vld [vmem:[%s3445_s1 + $0x270] sm:$0xff]  ;;  %v2675_v13 = vld [vmem:[%s3445_s1 + $0x3a8] sm:$0xff]  ;;  %v2682_v19 = vld [vmem:[%s3445_s1 + $0x3e0] sm:$0xff] }
  0x23   :  { %1534 = vmatpush.bf16.msrb.mxu2 %v2613_v31  ;;  %1472 = vmatmul.bf16.vlgmr.msra.gmra.mxu1 %v66_v48  ;;  %v2652_v31 = vld [vmem:[%s3445_s1 + $0x2f0] sm:$0xff]  ;;  %v2623_v48 = vld [vmem:[%s3445_s1 + $0x208] sm:$0xff]  ;;  %v2657_v20 = vld [vmem:[%s3445_s1 + $0x318] sm:$0xff] }
  0x24   :  { %1520 = vmatpush.bf16.msrb.mxu1 %v2605_v38  ;;  %1500 = vmatmul.bf16.vlgmr.msra.gmra.mxu3 %v68_v49  ;;  %v2634_v38 = vld [vmem:[%s3445_s1 + $0x260] sm:$0xff]  ;;  %v2640_v45 = vld [vmem:[%s3445_s1 + $0x290] sm:$0xff]  ;;  %v2639_v49 = vld [vmem:[%s3445_s1 + $0x288] sm:$0xff] }
  0x25   :  { %1548 = vmatpush.bf16.msrb.mxu3 %v2621_v39  ;;  %v2650_v39 = vld [vmem:[%s3445_s1 + $0x2e0] sm:$0xff]  ;;  %v2667_v14 = vld [vmem:[%s3445_s1 + $0x368] sm:$0xff]  ;;  %v2673_v21 = vld [vmem:[%s3445_s1 + $0x398] sm:$0xff] }
  0x26   :  { %1507 = vmatpush.bf16.msrb.mxu0 %v2596_v46  ;;  %v2632_v46 = vld [vmem:[%s3445_s1 + $0x250] sm:$0xff]  ;;  %v2683_v15 = vld [vmem:[%s3445_s1 + $0x3e8] sm:$0xff] }
  0x27   :  { %1535 = vmatpush.bf16.msrb.mxu2 %v2612_v47  ;;  %v2648_v47 = vld [vmem:[%s3445_s1 + $0x2d0] sm:$0xff] }
  0x28   :  { %1521 = vmatpush.bf16.msrb.mxu1 %v2604_v50  ;;  %v2631_v50 = vld [vmem:[%s3445_s1 + $0x248] sm:$0xff] }
  0x29   :  { %1549 = vmatpush.bf16.msrb.mxu3 %v2620_v51  ;;  %v2647_v51 = vld [vmem:[%s3445_s1 + $0x2c8] sm:$0xff] }
  0x2a   :  { %1508 = vmatpush.bf16.msrb.mxu0 %v2595_v52  ;;  %v2622_v52 = vld [vmem:[%s3445_s1 + $0x200] sm:$0xff] }
  0x2b   :  { %1536 = vmatpush.bf16.msrb.mxu2 %v2611_v53  ;;  %v2638_v53 = vld [vmem:[%s3445_s1 + $0x280] sm:$0xff] }
  0x2c   :  { %1522 = vmatpush.bf16.msrb.mxu1 %v2603_v54  ;;  %v2661_v54 = vld [vmem:[%s3445_s1 + $0x338] sm:$0xff] }
  0x2d   :  { %1550 = vmatpush.bf16.msrb.mxu3 %v2619_v55  ;;  %v2677_v55 = vld [vmem:[%s3445_s1 + $0x3b8] sm:$0xff] }
  0x2e   :  { %1509 = vmatpush.bf16.msrb.mxu0 %v2594_v56  ;;  %v29_v56 = vld [vmem:[%s3446_s0 + $0x40] sm:$0xff] }
  0x2f   :  { %1537 = vmatpush.bf16.msrb.mxu2 %v2610_v57  ;;  %v51_v57 = vld [vmem:[%s3446_s0 + $0xf0] sm:$0xff] }
  0x30   :  { %1523 = vmatpush.bf16.msrb.mxu1 %v2602_v58  ;;  %v31_v58 = vld [vmem:[%s3446_s0 + $0x50] sm:$0xff] }
  0x31   :  { %1551 = vmatpush.bf16.msrb.mxu3 %v2618_v59  ;;  %v53_v59 = vld [vmem:[%s3446_s0 + $0x100] sm:$0xff] }
  0x32   :  { %1510 = vmatpush.bf16.msrb.mxu0 %v2593_v60  ;;  %v2630_v60 = vld [vmem:[%s3445_s1 + $0x240] sm:$0xff] }
  0x33   :  { %1538 = vmatpush.bf16.msrb.mxu2 %v2609_v61  ;;  %v2646_v61 = vld [vmem:[%s3445_s1 + $0x2c0] sm:$0xff] }
  0x34   :  { %1524 = vmatpush.bf16.msrb.mxu1 %v2601_v62  ;;  %v30_v62 = vld [vmem:[%s3446_s0 + $0x48] sm:$0xff] }
  0x35   :  { %1552 = vmatpush.bf16.msrb.mxu3 %v2617_v63  ;;  %v52_v63 = vld [vmem:[%s3446_s0 + $0xf8] sm:$0xff] }
  0x36   :  { %1511 = vmatpush.bf16.msrb.mxu0 %v2592_v0  ;;  %v32_v0 = vld [vmem:[%s3446_s0 + $0x58] sm:$0xff] }
  0x37   :  { %1539 = vmatpush.bf16.msrb.mxu2 %v2608_v1  ;;  %v54_v1 = vld [vmem:[%s3446_s0 + $0x108] sm:$0xff] }
  0x38   :  { %1525 = vmatpush.bf16.msrb.mxu1 %v2600_v2  ;;  %v73_v2 = vpack.c.bf16 %v51_v57, %v29_v56  ;;  %v2691_v56 = vld [vmem:[%s3445_s1 + $0x428] sm:$0xff] }
  0x39   :  { %1553 = vmatpush.bf16.msrb.mxu3 %v2616_v3  ;;  %v75_v3 = vpack.c.bf16 %v53_v59, %v31_v58  ;;  %v2707_v57 = vld [vmem:[%s3445_s1 + $0x4a8] sm:$0xff] }
  0x3a   :  { %1512 = vmatpush.bf16.msrb.mxu0 %v2591_v4  ;;  %v2669_v4 = vld [vmem:[%s3445_s1 + $0x378] sm:$0xff]  ;;  %v2699_v58 = vld [vmem:[%s3445_s1 + $0x468] sm:$0xff] }
  0x3b   :  { %1540 = vmatpush.bf16.msrb.mxu2 %v2607_v5  ;;  %v2685_v5 = vld [vmem:[%s3445_s1 + $0x3f8] sm:$0xff]  ;;  %v2715_v59 = vld [vmem:[%s3445_s1 + $0x4e8] sm:$0xff] }
  0x3c   :  { %1526 = vmatpush.bf16.msrb.mxu1 %v2599_v6  ;;  %v74_v6 = vpack.c.bf16 %v52_v63, %v30_v62  ;;  %v2698_v62 = vld [vmem:[%s3445_s1 + $0x460] sm:$0xff] }
  0x3d   :  { %1554 = vmatpush.bf16.msrb.mxu3 %v2615_v7  ;;  %v76_v7 = vpack.c.bf16 %v54_v1, %v32_v0  ;;  %v2714_v63 = vld [vmem:[%s3445_s1 + $0x4e0] sm:$0xff]  ;;  %v2689_v0 = vld [vmem:[%s3445_s1 + $0x418] sm:$0xff] }
  0x3e   :  { %1513 = vmatpush.bf16.msrb.mxu0 %v2590_v8  ;;  %v2660_v8 = vld [vmem:[%s3445_s1 + $0x330] sm:$0xff]  ;;  %v2705_v1 = vld [vmem:[%s3445_s1 + $0x498] sm:$0xff] }
  0x3f   :  { %1541 = vmatpush.bf16.msrb.mxu2 %v2606_v9  ;;  %v2676_v9 = vld [vmem:[%s3445_s1 + $0x3b0] sm:$0xff] }
  0x40   :  { %1527 = vmatpush.bf16.msrb.mxu1 %v2598_v16  ;;  %v2658_v16 = vld [vmem:[%s3445_s1 + $0x320] sm:$0xff] }
  0x41   :  { %1555 = vmatpush.bf16.msrb.mxu3 %v2614_v17  ;;  %1514 = vmatmul.bf16.vlgmr.msrb.gmra.mxu0 %v69_v22  ;;  %v2674_v17 = vld [vmem:[%s3445_s1 + $0x3a0] sm:$0xff]  ;;  %v2665_v22 = vld [vmem:[%s3445_s1 + $0x358] sm:$0xff] }
  0x42   :  { %1562 = vmatpush.bf16.msra.mxu0 %v2629_v10  ;;  %1542 = vmatmul.bf16.vlgmr.msrb.gmra.mxu2 %v71_v23  ;;  %v2668_v10 = vld [vmem:[%s3445_s1 + $0x370] sm:$0xff]  ;;  %v2681_v23 = vld [vmem:[%s3445_s1 + $0x3d8] sm:$0xff] }
  0x43   :  { %1590 = vmatpush.bf16.msra.mxu2 %v2645_v11  ;;  %1528 = vmatmul.bf16.vlgmr.msrb.gmra.mxu1 %v70_v26  ;;  %v2684_v11 = vld [vmem:[%s3445_s1 + $0x3f0] sm:$0xff] }
  0x44   :  { %1576 = vmatpush.bf16.msra.mxu1 %v2637_v24  ;;  %1556 = vmatmul.bf16.vlgmr.msrb.gmra.mxu3 %v72_v27  ;;  %v2656_v24 = vld [vmem:[%s3445_s1 + $0x310] sm:$0xff] }
  0x45   :  { %1604 = vmatpush.bf16.msra.mxu3 %v2653_v25  ;;  %v2672_v25 = vld [vmem:[%s3445_s1 + $0x390] sm:$0xff] }
  0x46   :  { %1563 = vmatpush.bf16.msra.mxu0 %v2628_v28  ;;  %v2664_v26 = vld [vmem:[%s3445_s1 + $0x350] sm:$0xff]  ;;  %v2655_v28 = vld [vmem:[%s3445_s1 + $0x308] sm:$0xff] }
  0x47   :  { %1591 = vmatpush.bf16.msra.mxu2 %v2644_v29  ;;  %v2680_v27 = vld [vmem:[%s3445_s1 + $0x3d0] sm:$0xff]  ;;  %v2671_v29 = vld [vmem:[%s3445_s1 + $0x388] sm:$0xff] }
  0x48   :  { %1577 = vmatpush.bf16.msra.mxu1 %v2636_v30  ;;  %v2663_v30 = vld [vmem:[%s3445_s1 + $0x348] sm:$0xff] }
  0x49   :  { %1605 = vmatpush.bf16.msra.mxu3 %v2652_v31  ;;  %v2679_v31 = vld [vmem:[%s3445_s1 + $0x3c8] sm:$0xff] }
  0x4a   :  { %1564 = vmatpush.bf16.msra.mxu0 %v2627_v32  ;;  %v2654_v32 = vld [vmem:[%s3445_s1 + $0x300] sm:$0xff] }
  0x4b   :  { %1592 = vmatpush.bf16.msra.mxu2 %v2643_v33  ;;  %v2670_v33 = vld [vmem:[%s3445_s1 + $0x380] sm:$0xff] }
  0x4c   :  { %1578 = vmatpush.bf16.msra.mxu1 %v2635_v34  ;;  %v2693_v34 = vld [vmem:[%s3445_s1 + $0x438] sm:$0xff] }
  0x4d   :  { %1606 = vmatpush.bf16.msra.mxu3 %v2651_v35  ;;  %v2709_v35 = vld [vmem:[%s3445_s1 + $0x4b8] sm:$0xff] }
  0x4e   :  { %1565 = vmatpush.bf16.msra.mxu0 %v2626_v36  ;;  %v33_v36 = vld [vmem:[%s3446_s0 + $0x60] sm:$0xff] }
  0x4f   :  { %1593 = vmatpush.bf16.msra.mxu2 %v2642_v37  ;;  %v55_v37 = vld [vmem:[%s3446_s0 + $0x110] sm:$0xff] }
  0x50   :  { %1579 = vmatpush.bf16.msra.mxu1 %v2634_v38  ;;  %v35_v38 = vld [vmem:[%s3446_s0 + $0x70] sm:$0xff] }
  0x51   :  { %1607 = vmatpush.bf16.msra.mxu3 %v2650_v39  ;;  %v57_v39 = vld [vmem:[%s3446_s0 + $0x120] sm:$0xff] }
  0x52   :  { %1566 = vmatpush.bf16.msra.mxu0 %v2625_v40  ;;  %v2662_v40 = vld [vmem:[%s3445_s1 + $0x340] sm:$0xff] }
  0x53   :  { %1594 = vmatpush.bf16.msra.mxu2 %v2641_v41  ;;  %v2678_v41 = vld [vmem:[%s3445_s1 + $0x3c0] sm:$0xff] }
  0x54   :  { %1580 = vmatpush.bf16.msra.mxu1 %v2633_v42  ;;  %v34_v42 = vld [vmem:[%s3446_s0 + $0x68] sm:$0xff] }
  0x55   :  { %1608 = vmatpush.bf16.msra.mxu3 %v2649_v43  ;;  %v56_v43 = vld [vmem:[%s3446_s0 + $0x118] sm:$0xff] }
  0x56   :  { %1567 = vmatpush.bf16.msra.mxu0 %v2624_v44  ;;  %v36_v44 = vld [vmem:[%s3446_s0 + $0x78] sm:$0xff] }
  0x57   :  { %1595 = vmatpush.bf16.msra.mxu2 %v2640_v45  ;;  %v58_v45 = vld [vmem:[%s3446_s0 + $0x128] sm:$0xff] }
  0x58   :  { %1581 = vmatpush.bf16.msra.mxu1 %v2632_v46  ;;  %v77_v46 = vpack.c.bf16 %v55_v37, %v33_v36  ;;  %v2721_v36 = vld [vmem:[%s3445_s1 + $0x518] sm:$0xff]  ;;  %v42_v37 = vld [vmem:[%s3446_s0 + $0xa8] sm:$0xff] }
  0x59   :  { %1609 = vmatpush.bf16.msra.mxu3 %v2648_v47  ;;  %v79_v47 = vpack.c.bf16 %v57_v39, %v35_v38  ;;  %v64_v38 = vld [vmem:[%s3446_s0 + $0x158] sm:$0xff] }
  0x5a   :  { %1568 = vmatpush.bf16.msra.mxu0 %v2623_v48  ;;  %v2701_v48 = vld [vmem:[%s3445_s1 + $0x478] sm:$0xff]  ;;  %v86_v39 = vpack.c.bf16 %v64_v38, %v42_v37 }
  0x5b   :  { %1596 = vmatpush.bf16.msra.mxu2 %v2639_v49  ;;  %v2717_v49 = vld [vmem:[%s3445_s1 + $0x4f8] sm:$0xff] }
  0x5c   :  { %1582 = vmatpush.bf16.msra.mxu1 %v2631_v50  ;;  %v78_v50 = vpack.c.bf16 %v56_v43, %v34_v42  ;;  %v2718_v42 = vld [vmem:[%s3445_s1 + $0x500] sm:$0xff] }
  0x5d   :  { %1610 = vmatpush.bf16.msra.mxu3 %v2647_v51  ;;  %v80_v51 = vpack.c.bf16 %v58_v45, %v36_v44  ;;  %v41_v43 = vld [vmem:[%s3446_s0 + $0xa0] sm:$0xff]  ;;  %v63_v44 = vld [vmem:[%s3446_s0 + $0x150] sm:$0xff] }
  0x5e   :  { %1569 = vmatpush.bf16.msra.mxu0 %v2622_v52  ;;  %v2692_v52 = vld [vmem:[%s3445_s1 + $0x430] sm:$0xff]  ;;  %v85_v45 = vpack.c.bf16 %v63_v44, %v41_v43  ;;  %v2727_v43 = vld [vmem:[%s3449_s3] sm:$0xff] }
  0x5f   :  { %1597 = vmatpush.bf16.msra.mxu2 %v2638_v53  ;;  %v2708_v53 = vld [vmem:[%s3445_s1 + $0x4b0] sm:$0xff] }
  0x60   :  { %1583 = vmatpush.bf16.msra.mxu1 %v2630_v60  ;;  %v2690_v60 = vld [vmem:[%s3445_s1 + $0x420] sm:$0xff] }
  0x61   :  { %1611 = vmatpush.bf16.msra.mxu3 %v2646_v61  ;;  %1570 = vmatmul.bf16.vlgmr.msra.gmra.mxu0 %v73_v2  ;;  %v2706_v61 = vld [vmem:[%s3445_s1 + $0x4a0] sm:$0xff]  ;;  %v2697_v2 = vld [vmem:[%s3445_s1 + $0x458] sm:$0xff] }
  0x62   :  { %1618 = vmatpush.bf16.msrb.mxu0 %v2661_v54  ;;  %1598 = vmatmul.bf16.vlgmr.msra.gmra.mxu2 %v75_v3  ;;  %v2700_v54 = vld [vmem:[%s3445_s1 + $0x470] sm:$0xff]  ;;  %v2713_v3 = vld [vmem:[%s3445_s1 + $0x4d8] sm:$0xff] }
  0x63   :  { %1646 = vmatpush.bf16.msrb.mxu2 %v2677_v55  ;;  %1584 = vmatmul.bf16.vlgmr.msra.gmra.mxu1 %v74_v6  ;;  %v2716_v55 = vld [vmem:[%s3445_s1 + $0x4f0] sm:$0xff] }
  0x64   :  { %1632 = vmatpush.bf16.msrb.mxu1 %v2669_v4  ;;  %1612 = vmatmul.bf16.vlgmr.msra.gmra.mxu3 %v76_v7  ;;  %v2688_v4 = vld [vmem:[%s3445_s1 + $0x410] sm:$0xff] }
  0x65   :  { %1660 = vmatpush.bf16.msrb.mxu3 %v2685_v5  ;;  %v2704_v5 = vld [vmem:[%s3445_s1 + $0x490] sm:$0xff] }
  0x66   :  { %1619 = vmatpush.bf16.msrb.mxu0 %v2660_v8  ;;  %v2696_v6 = vld [vmem:[%s3445_s1 + $0x450] sm:$0xff]  ;;  %v2687_v8 = vld [vmem:[%s3445_s1 + $0x408] sm:$0xff] }
  0x67   :  { %1647 = vmatpush.bf16.msrb.mxu2 %v2676_v9  ;;  %v2712_v7 = vld [vmem:[%s3445_s1 + $0x4d0] sm:$0xff]  ;;  %v2703_v9 = vld [vmem:[%s3445_s1 + $0x488] sm:$0xff] }
  0x68   :  { %1633 = vmatpush.bf16.msrb.mxu1 %v2668_v10  ;;  %v2695_v10 = vld [vmem:[%s3445_s1 + $0x448] sm:$0xff] }
  0x69   :  { %1661 = vmatpush.bf16.msrb.mxu3 %v2684_v11  ;;  %v2711_v11 = vld [vmem:[%s3445_s1 + $0x4c8] sm:$0xff] }
  0x6a   :  { %1620 = vmatpush.bf16.msrb.mxu0 %v2659_v12  ;;  %v2686_v12 = vld [vmem:[%s3445_s1 + $0x400] sm:$0xff] }
  0x6b   :  { %1648 = vmatpush.bf16.msrb.mxu2 %v2675_v13  ;;  %v2523_v13 = vld [vmem:[%s3445_s1 + $0x540] sm:$0xf] }
  0x6c   :  { %1634 = vmatpush.bf16.msrb.mxu1 %v2667_v14  ;;  %v2726_v14 = vld [vmem:[%s3445_s1 + $0x540] sm:$0x30] }
  0x6d   :  { %1662 = vmatpush.bf16.msrb.mxu3 %v2683_v15  ;;  %v2702_v15 = vld [vmem:[%s3445_s1 + $0x480] sm:$0xff] }
  0x6e   :  { %1621 = vmatpush.bf16.msrb.mxu0 %v2658_v16  ;;  %v2725_v16 = vld [vmem:[%s3445_s1 + $0x538] sm:$0xff] }
  0x6f   :  { %1649 = vmatpush.bf16.msrb.mxu2 %v2674_v17  ;;  %v37_v17 = vld [vmem:[%s3446_s0 + $0x80] sm:$0xff] }
  0x70   :  { %1635 = vmatpush.bf16.msrb.mxu1 %v2666_v18  ;;  %v59_v18 = vld [vmem:[%s3446_s0 + $0x130] sm:$0xff] }
  0x71   :  { %1663 = vmatpush.bf16.msrb.mxu3 %v2682_v19  ;;  %v39_v19 = vld [vmem:[%s3446_s0 + $0x90] sm:$0xff] }
  0x72   :  { %1622 = vmatpush.bf16.msrb.mxu0 %v2657_v20  ;;  %v61_v20 = vld [vmem:[%s3446_s0 + $0x140] sm:$0xff] }
  0x73   :  { %1650 = vmatpush.bf16.msrb.mxu2 %v2673_v21  ;;  %v2694_v21 = vld [vmem:[%s3445_s1 + $0x440] sm:$0xff] }
  0x74   :  { %1636 = vmatpush.bf16.msrb.mxu1 %v2665_v22  ;;  %v2710_v22 = vld [vmem:[%s3445_s1 + $0x4c0] sm:$0xff] }
  0x75   :  { %1664 = vmatpush.bf16.msrb.mxu3 %v2681_v23  ;;  %v38_v23 = vld [vmem:[%s3446_s0 + $0x88] sm:$0xff] }
  0x76   :  { %1623 = vmatpush.bf16.msrb.mxu0 %v2656_v24  ;;  %v2524_v24 = vor.u32 %v2726_v14, %v2523_v13 }
  0x77   :  { %1651 = vmatpush.bf16.msrb.mxu2 %v2672_v25  ;;  %v60_v25 = vld [vmem:[%s3446_s0 + $0x138] sm:$0xff] }
  0x78   :  { %1637 = vmatpush.bf16.msrb.mxu1 %v2664_v26  ;;  %v40_v26 = vld [vmem:[%s3446_s0 + $0x98] sm:$0xff] }
  0x79   :  { %1665 = vmatpush.bf16.msrb.mxu3 %v2680_v27  ;;  %v62_v27 = vld [vmem:[%s3446_s0 + $0x148] sm:$0xff] }
  0x7a   :  { %1624 = vmatpush.bf16.msrb.mxu0 %v2655_v28  ;;  %v81_v28 = vpack.c.bf16 %v59_v18, %v37_v17 }
  0x7b   :  { %1652 = vmatpush.bf16.msrb.mxu2 %v2671_v29  ;;  %v83_v29 = vpack.c.bf16 %v61_v20, %v39_v19  ;;  %v2731_v19 = vld [vmem:[%s3449_s3 + $0x20] sm:$0xff] }
  0x7c   :  { %1638 = vmatpush.bf16.msrb.mxu1 %v2663_v30  ;;  %v82_v30 = vpack.c.bf16 %v60_v25, %v38_v23 }
  0x7d   :  { %1666 = vmatpush.bf16.msrb.mxu3 %v2679_v31  ;;  %v84_v31 = vpack.c.bf16 %v62_v27, %v40_v26 }
  0x7e   :  { %1625 = vmatpush.bf16.msrb.mxu0 %v2654_v32  ;;  %v1448_v32 = vsel %vm1446_vm0, %v2524_v24, 0 }
  0x7f   :  { %1653 = vmatpush.bf16.msrb.mxu2 %v2670_v33  ;;  %v2724_v33 = vld [vmem:[%s3445_s1 + $0x530] sm:$0xff] }
  0x80   :  { %1639 = vmatpush.bf16.msrb.mxu1 %v2662_v40  ;;  %v2720_v40 = vld [vmem:[%s3445_s1 + $0x510] sm:$0xff] }
  0x81   :  { %1667 = vmatpush.bf16.msrb.mxu3 %v2678_v41  ;;  %1626 = vmatmul.bf16.vlgmr.msrb.gmra.mxu0 %v77_v46  ;;  %v2719_v41 = vld [vmem:[%s3445_s1 + $0x508] sm:$0xff] }
  0x82   :  { %1674 = vmatpush.bf16.msra.mxu0 %v2693_v34  ;;  %1654 = vmatmul.bf16.vlgmr.msrb.gmra.mxu2 %v79_v47  ;;  %v2723_v34 = vld [vmem:[%s3445_s1 + $0x528] sm:$0xff] }
  0x83   :  { %1702 = vmatpush.bf16.msra.mxu2 %v2709_v35  ;;  %1640 = vmatmul.bf16.vlgmr.msrb.gmra.mxu1 %v78_v50  ;;  %v2722_v35 = vld [vmem:[%s3445_s1 + $0x520] sm:$0xff] }
  0x84   :  { %1688 = vmatpush.bf16.msra.mxu1 %v2701_v48  ;;  %1668 = vmatmul.bf16.vlgmr.msrb.gmra.mxu3 %v80_v51 }
  0x85   :  { %1716 = vmatpush.bf16.msra.mxu3 %v2717_v49 }
  0x86   :  { %1675 = vmatpush.bf16.msra.mxu0 %v2692_v52 }
  0x87   :  { %1703 = vmatpush.bf16.msra.mxu2 %v2708_v53 }
  0x88   :  { %1689 = vmatpush.bf16.msra.mxu1 %v2700_v54 }
  0x89   :  { %1717 = vmatpush.bf16.msra.mxu3 %v2716_v55 }
  0x8a   :  { %1676 = vmatpush.bf16.msra.mxu0 %v2691_v56  ;;  %v2735_v56 = vld [vmem:[%s3447_s2] ss:$0 sm:$0xff] }
  0x8b   :  { %1704 = vmatpush.bf16.msra.mxu2 %v2707_v57 }
  0x8c   :  { %1690 = vmatpush.bf16.msra.mxu1 %v2699_v58 }
  0x8d   :  { %1718 = vmatpush.bf16.msra.mxu3 %v2715_v59 }
  0x8e   :  { %1677 = vmatpush.bf16.msra.mxu0 %v2690_v60 }
  0x8f   :  { %1705 = vmatpush.bf16.msra.mxu2 %v2706_v61 }
  0x90   :  { %1691 = vmatpush.bf16.msra.mxu1 %v2698_v62 }
  0x91   :  { %1719 = vmatpush.bf16.msra.mxu3 %v2714_v63 }
  0x92   :  { %1678 = vmatpush.bf16.msra.mxu0 %v2689_v0 }
  0x93   :  { %1706 = vmatpush.bf16.msra.mxu2 %v2705_v1 }
  0x94   :  { %1692 = vmatpush.bf16.msra.mxu1 %v2697_v2 }
  0x95   :  { %1720 = vmatpush.bf16.msra.mxu3 %v2713_v3 }
  0x96   :  { %1679 = vmatpush.bf16.msra.mxu0 %v2688_v4 }
  0x97   :  { %1707 = vmatpush.bf16.msra.mxu2 %v2704_v5 }
  0x98   :  { %1693 = vmatpush.bf16.msra.mxu1 %v2696_v6 }
  0x99   :  { %1721 = vmatpush.bf16.msra.mxu3 %v2712_v7  ;;  %v2734_v7 = vld [vmem:[%s3449_s3 + $0x38] sm:$0xff] }
  0x9a   :  { %1680 = vmatpush.bf16.msra.mxu0 %v2687_v8 }
  0x9b   :  { %1708 = vmatpush.bf16.msra.mxu2 %v2703_v9 }
  0x9c   :  { %1694 = vmatpush.bf16.msra.mxu1 %v2695_v10 }
  0x9d   :  { %1722 = vmatpush.bf16.msra.mxu3 %v2711_v11  ;;  %v2733_v11 = vld [vmem:[%s3449_s3 + $0x30] sm:$0xff] }
  0x9e   :  { %1681 = vmatpush.bf16.msra.mxu0 %v2686_v12  ;;  %v1459_v46 = vpop.f32.mrf.mxu0 }
  0x9f   :  { %1709 = vmatpush.bf16.msra.mxu2 %v2702_v15  ;;  %v1460_v60 = vadd.f32 %v2735_v56, %v1459_v46  ;;  %v2732_v15 = vld [vmem:[%s3449_s3 + $0x28] sm:$0xff] }
  0xa0   :  { %1695 = vmatpush.bf16.msra.mxu1 %v2694_v21  ;;  %v1473_v47 = vpop.f32.mrf.mxu1 }
  0xa1   :  { %1723 = vmatpush.bf16.msra.mxu3 %v2710_v22  ;;  %1682 = vmatmul.bf16.vlgmr.msra.gmra.mxu0 %v81_v28  ;;  %v1474_v62 = vadd.f32 %v1473_v47, %v1460_v60  ;;  %v2730_v28 = vld [vmem:[%s3449_s3 + $0x18] sm:$0xff] }
  0xa2   :  { %1730 = vmatpush.bf16.msrb.mxu0 %v2725_v16  ;;  %1710 = vmatmul.bf16.vlgmr.msra.gmra.mxu2 %v83_v29 }
  0xa3   :  { %1696 = vmatmul.bf16.vlgmr.msra.gmra.mxu1 %v82_v30  ;;  %1829 = vmatpush.bf16.msrb.mxu2 %v2734_v7 }
  0xa4   :  { %1751 = vmatpush.bf16.msrb.mxu1 %v1448_v32  ;;  %1724 = vmatmul.bf16.vlgmr.msra.gmra.mxu3 %v84_v31  ;;  %v2729_v32 = vld [vmem:[%s3449_s3 + $0x10] sm:$0xff] }
  0xa5   :  { %v1487_v48 = vpop.f32.mrf.mxu2 }
  0xa6   :  { %1731 = vmatpush.bf16.msrb.mxu0 %v2724_v33  ;;  %v1461_v49 = vpop.f32.mrf.mxu0  ;;  %v1488_v2 = vadd.f32 %v1487_v48, %v1474_v62 }
  0xa7   :  { %v1501_v51 = vpop.f32.mrf.mxu3  ;;  %v1462_v3 = vadd.f32 %v2735_v56, %v1461_v49  ;;  %1830 = vmatpush.bf16.msrb.mxu2 %v2733_v11 }
  0xa8   :  { %v1475_v50 = vpop.f32.mrf.mxu1  ;;  %v1502_v5 = vadd.f32 %v1501_v51, %v1488_v2 }
  0xa9   :  { %v1476_v6 = vadd.f32 %v1475_v50, %v1462_v3 }
  0xaa   :  { %1732 = vmatpush.bf16.msrb.mxu0 %v2723_v34 }
  0xab   :  { %1831 = vmatpush.bf16.msrb.mxu2 %v2732_v15 }
  0xad   :  { %v1489_v52 = vpop.f32.mrf.mxu2 }
  0xae   :  { %1733 = vmatpush.bf16.msrb.mxu0 %v2722_v35  ;;  %v1490_v9 = vadd.f32 %v1489_v52, %v1476_v6 }
  0xaf   :  { %v1503_v55 = vpop.f32.mrf.mxu3  ;;  %1832 = vmatpush.bf16.msrb.mxu2 %v2731_v19 }
  0xb0   :  { %v1504_v16 = vadd.f32 %v1503_v55, %v1490_v9 }
  0xb2   :  { %1734 = vmatpush.bf16.msrb.mxu0 %v2721_v36 }
  0xb3   :  { %2525 = vmatmul.msk.bf16.vlgmr.msrb.gmra.mxu1 %vm1442_vm1, %v86_v39  ;;  %1833 = vmatpush.bf16.msrb.mxu2 %v2730_v28  ;;  %v2728_v39 = vld [vmem:[%s3449_s3 + $0x8] sm:$0xff] }
  0xb6   :  { %1735 = vmatpush.bf16.msrb.mxu0 %v2720_v40 }
  0xb7   :  { %1834 = vmatpush.bf16.msrb.mxu2 %v2729_v32 }
  0xba   :  { %1736 = vmatpush.bf16.msrb.mxu0 %v2719_v41 }
  0xbb   :  { %1835 = vmatpush.bf16.msrb.mxu2 %v2728_v39 }
  0xbe   :  { %1737 = vmatpush.bf16.msrb.mxu0 %v2718_v42  ;;  %v1515_v53 = vpop.f32.mrf.mxu0 }
  0xbf   :  { %v1516_v10 = vadd.f32 %v1515_v53, %v1502_v5  ;;  %1836 = vmatpush.bf16.msrb.mxu2 %v2727_v43 }
  0xc0   :  { %v1529_v54 = vpop.f32.mrf.mxu1 }
  0xc1   :  { %1738 = vmatmul.bf16.vlgmr.msrb.gmra.mxu0 %v85_v45  ;;  %v1530_v17 = vadd.f32 %v1529_v54, %v1516_v10 }
  0xc5   :  { %v1543_v57 = vpop.f32.mrf.mxu2 }
  0xc6   :  { %v1517_v58 = vpop.f32.mrf.mxu0  ;;  %v1544_v20 = vadd.f32 %v1543_v57, %v1530_v17 }
  0xc7   :  { %v1557_v61 = vpop.f32.mrf.mxu3  ;;  %v1518_v18 = vadd.f32 %v1517_v58, %v1504_v16 }
  0xc8   :  { %v1531_v59 = vpop.f32.mrf.mxu1  ;;  %v1558_v25 = vadd.f32 %v1557_v61, %v1544_v20 }
  0xc9   :  { %v1532_v24 = vadd.f32 %v1531_v59, %v1518_v18  ;;  %v2736_v18 = vld [vmem:[%s3448_s4] ss:$0 sm:$0xff] }
  0xcd   :  { %v1545_v63 = vpop.f32.mrf.mxu2 }
  0xce   :  { %v1546_v26 = vadd.f32 %v1545_v63, %v1532_v24 }
  0xcf   :  { %v1559_v4 = vpop.f32.mrf.mxu3 }
  0xd0   :  { %v1560_v30 = vadd.f32 %v1559_v4, %v1546_v26 }
  0xde   :  { %v1571_v0 = vpop.f32.mrf.mxu0 }
  0xdf   :  { %v1572_v29 = vadd.f32 %v1571_v0, %v1558_v25 }
  0xe0   :  { %v1585_v1 = vpop.f32.mrf.mxu1 }
  0xe1   :  { %v1586_v33 = vadd.f32 %v1585_v1, %v1572_v29 }
  0xe5   :  { %v1599_v8 = vpop.f32.mrf.mxu2 }
  0xe6   :  { %v1573_v12 = vpop.f32.mrf.mxu0  ;;  %v1600_v37 = vadd.f32 %v1599_v8, %v1586_v33 }
  0xe7   :  { %v1613_v14 = vpop.f32.mrf.mxu3  ;;  %v1574_v34 = vadd.f32 %v1573_v12, %v1560_v30 }
  0xe8   :  { %v1587_v13 = vpop.f32.mrf.mxu1  ;;  %v1614_v41 = vadd.f32 %v1613_v14, %v1600_v37 }
  0xe9   :  { %v1588_v40 = vadd.f32 %v1587_v13, %v1574_v34 }
  0xed   :  { %v1601_v21 = vpop.f32.mrf.mxu2 }
  0xee   :  { %v1602_v42 = vadd.f32 %v1601_v21, %v1588_v40 }
  0xef   :  { %v1615_v27 = vpop.f32.mrf.mxu3 }
  0xf0   :  { %v1616_v48 = vadd.f32 %v1615_v27, %v1602_v42 }
  0xfe   :  { %v1627_v22 = vpop.f32.mrf.mxu0 }
  0xff   :  { %v1628_v44 = vadd.f32 %v1627_v22, %v1614_v41 }
 0x100   :  { %v1641_v23 = vpop.f32.mrf.mxu1 }
 0x101   :  { %v1642_v49 = vadd.f32 %v1641_v23, %v1628_v44 }
 0x105   :  { %v1655_v31 = vpop.f32.mrf.mxu2 }
 0x106   :  { %v1629_v35 = vpop.f32.mrf.mxu0  ;;  %v1656_v52 = vadd.f32 %v1655_v31, %v1642_v49 }
 0x107   :  { %v1669_v38 = vpop.f32.mrf.mxu3  ;;  %v1630_v50 = vadd.f32 %v1629_v35, %v1616_v48 }
 0x108   :  { %v1643_v36 = vpop.f32.mrf.mxu1  ;;  %v1670_v55 = vadd.f32 %v1669_v38, %v1656_v52 }
 0x109   :  { %v1644_v53 = vadd.f32 %v1643_v36, %v1630_v50 }
 0x10d   :  { %v1657_v45 = vpop.f32.mrf.mxu2 }
 0x10e   :  { %v1658_v56 = vadd.f32 %v1657_v45, %v1644_v53 }
 0x10f   :  { %v1671_v51 = vpop.f32.mrf.mxu3 }
 0x110   :  { %v1672_v61 = vadd.f32 %v1671_v51, %v1658_v56 }
 0x11e   :  { %v1683_v46 = vpop.f32.mrf.mxu0 }
 0x11f   :  { %v1684_v59 = vadd.f32 %v1683_v46, %v1670_v55 }
 0x120   :  { %v1697_v47 = vpop.f32.mrf.mxu1 }
 0x121   :  { %v1698_v62 = vadd.f32 %v1697_v47, %v1684_v59 }
 0x125   :  { %v1711_v54 = vpop.f32.mrf.mxu2 }
 0x126   :  { %v1685_v57 = vpop.f32.mrf.mxu0  ;;  %v1712_v0 = vadd.f32 %v1711_v54, %v1698_v62 }
 0x127   :  { %v1725_v60 = vpop.f32.mrf.mxu3  ;;  %v1686_v63 = vadd.f32 %v1685_v57, %v1672_v61 }
 0x128   :  { %v1699_v58 = vpop.f32.mrf.mxu1  ;;  %v1726_v5 = vadd.f32 %v1725_v60, %v1712_v0 }
 0x129   :  { %v1700_v4 = vadd.f32 %v1699_v58, %v1686_v63 }
 0x12d   :  { %v1713_v1 = vpop.f32.mrf.mxu2 }
 0x12e   :  { %v1714_v6 = vadd.f32 %v1713_v1, %v1700_v4 }
 0x12f   :  { %v1727_v7 = vpop.f32.mrf.mxu3 }
 0x130   :  { %v1753_v2 = vpop.f32.mrf.mxu1  ;;  %v1728_v9 = vadd.f32 %v1727_v7, %v1714_v6 }
 0x138   :  { %v1755_v13 = vpop.f32.mrf.mxu1 }
 0x13e   :  { %v1739_v3 = vpop.f32.mrf.mxu0 }
 0x13f   :  { %v1740_v8 = vadd.f32 %v1739_v3, %v1726_v5 }
 0x141   :  { %v1754_v11 = vadd.f32 %v1753_v2, %v1740_v8 }
 0x143   :  { %v1758_v15 = vmax.f32 %v1754_v11, 0.0 }
 0x146   :  { %v1741_v10 = vpop.f32.mrf.mxu0 }
 0x147   :  { %v1742_v12 = vadd.f32 %v1741_v10, %v1728_v9 }
 0x149   :  { %v1756_v14 = vadd.f32 %v1755_v13, %v1742_v12 }
 0x14b   :  { %v1759_v16 = vmax.f32 %v1756_v14, 0.0 }
 0x14d   :  { %v1760_v17 = vpack.c.bf16 %v1759_v16, %v1758_v15 }
 0x14f   :  { %1837 = vmatmul.bf16.vlgmr.msrb.gmra.mxu2 %v1760_v17 }
 0x1d2   :  { %v1838_v19 = vpop.f32.mrf.mxu2 }
 0x1d3   :  { %v1839_v20 = vadd.f32 %v2736_v18, %v1838_v19 }
 0x1d5   :  { %1843 = vst [vmem:[%s3450_s5] sm:$0xff] %v1839_v20 }
 0x1da   :  { %v1840_v21 = vpop.f32.mrf.mxu2 }
 0x1db   :  { %v1841_v22 = vadd.f32 %v2736_v18, %v1840_v21 }
 0x1dd   :  { %1844 = vst [vmem:[%s3450_s5 + $0x8] sm:$0xff] %v1841_v22 }

</bundles_post_ra>
